<compile_context>
chip_gen: v6e
topology: v6e:2x2x1
jax: 0.10.0
libtpu: 0.0.40
codegen_flags: <defaults>
</compile_context>

<pallas_src>
import functools
import math

import jax
import jax.numpy as jnp
from jax import lax
from jax.experimental import pallas as pl
from jax.experimental.pallas import tpu as pltpu


# ----------------------------------------------------------------------------
# helpers
# ----------------------------------------------------------------------------
def _row_tile(n, max_tile=256):
    """Largest power-of-two row tile (>=8) that divides n; else the full extent."""
    t = min(max_tile, n)
    for cand in (256, 128, 64, 32, 16, 8):
        if cand <= t and n % cand == 0:
            return cand
    return n


# ----------------------------------------------------------------------------
# Pallas kernels
# ----------------------------------------------------------------------------
def _linear_kernel(x_ref, w_ref, b_ref, o_ref, *, activation):
    y = jnp.dot(x_ref[...], w_ref[...], preferred_element_type=jnp.float32)
    y = y + b_ref[...]
    if activation == "relu":
        y = jnp.maximum(y, 0.0)
    o_ref[...] = y.astype(o_ref.dtype)


def linear(x, w_t, b, activation=None):
    """y = x @ w_t + b  (w_t is the pre-transposed (in, out) weight, b is (1, out))."""
    M, d_in = x.shape
    d_out = w_t.shape[1]
    tile_m = _row_tile(M)
    return pl.pallas_call(
        functools.partial(_linear_kernel, activation=activation),
        grid=(M // tile_m,),
        out_shape=jax.ShapeDtypeStruct((M, d_out), jnp.float32),
        in_specs=[
            pl.BlockSpec((tile_m, d_in), lambda i: (i, 0)),
            pl.BlockSpec((d_in, d_out), lambda i: (0, 0)),
            pl.BlockSpec((1, d_out), lambda i: (0, 0)),
        ],
        out_specs=pl.BlockSpec((tile_m, d_out), lambda i: (i, 0)),
        compiler_params=pltpu.CompilerParams(dimension_semantics=("parallel",)),
    )(x, w_t, b)


def _fused_hyattn_kernel(dst_ref, src_ref, wq_ref, bq_ref, wk_ref, bk_ref,
                         wv_ref, bv_ref, m_ref, *rest, scale, with_dropout):
    """Fused q/k/v projection + masked-softmax bipartite attention (+ optional dropout)."""
    if with_dropout:
        drop_ref, o_ref, odrop_ref = rest
    else:
        (o_ref,) = rest

    # fused projections (was 3 separate pallas_calls + HBM round-trips)
    q = jnp.dot(dst_ref[...], wq_ref[...], preferred_element_type=jnp.float32) + bq_ref[...]
    k = jnp.dot(src_ref[...], wk_ref[...], preferred_element_type=jnp.float32) + bk_ref[...]
    v = jnp.dot(src_ref[...], wv_ref[...], preferred_element_type=jnp.float32) + bv_ref[...]

    # fold 1/sqrt(q_d) into q: leaky_relu is positively homogeneous, so
    # leaky_relu(q.k)/sqrt(q_d) == leaky_relu((q/sqrt(q_d)).k)
    q = q * scale

    # scores over incident (dst, src) pairs
    s = lax.dot_general(q, k,
                        dimension_numbers=(((1,), (1,)), ((), ())),
                        preferred_element_type=jnp.float32)
    s = jnp.where(s >= 0.0, s, 0.01 * s)              # F.leaky_relu default slope
    incident = m_ref[...] > 0.0
    s = jnp.where(incident, s, -1e30)                  # softmax restricted to the mailbox

    mmax = jnp.max(s, axis=-1, keepdims=True)
    p = jnp.exp(s - mmax)
    denom = jnp.sum(p, axis=-1, keepdims=True)
    attn = p * (1.0 / denom)                           # (D,1) reciprocal + broadcast multiply
    agg = jnp.dot(attn, v, preferred_element_type=jnp.float32)

    # destinations with no incident source receive no message -> zeros (DGL semantics)
    has_msg = jnp.sum(m_ref[...], axis=-1, keepdims=True) > 0.0
    agg = jnp.where(has_msg, agg, 0.0)

    o_ref[...] = agg.astype(o_ref.dtype)
    if with_dropout:
        odrop_ref[...] = (agg * drop_ref[...]).astype(odrop_ref.dtype)


def fused_hyper_attention(dst_feat, src_feat, wq, bq, wk, bk, wv, bv, mask, q_d,
                          drop_mult=None):
    """One pallas_call per message-passing direction.

    dst_feat: (D, d_dst), src_feat: (S, d_src), mask: (D, S) 0/1 incidence.
    Returns aggregated (D, dv); if drop_mult is given also returns the dropped-out copy.
    """
    D, d_dst = dst_feat.shape
    S, d_src = src_feat.shape
    qd = wq.shape[1]
    dv = wv.shape[1]
    tile_d = _row_tile(D)
    with_dropout = drop_mult is not None

    in_specs = [
        pl.BlockSpec((tile_d, d_dst), lambda i: (i, 0)),   # dst features (tiled, parallel)
        pl.BlockSpec((S, d_src), lambda i: (0, 0)),        # src features (resident)
        pl.BlockSpec((d_dst, qd), lambda i: (0, 0)),       # Wq
        pl.BlockSpec((1, qd), lambda i: (0, 0)),           # bq
        pl.BlockSpec((d_src, qd), lambda i: (0, 0)),       # Wk
        pl.BlockSpec((1, qd), lambda i: (0, 0)),           # bk
        pl.BlockSpec((d_src, dv), lambda i: (0, 0)),       # Wv
        pl.BlockSpec((1, dv), lambda i: (0, 0)),           # bv
        pl.BlockSpec((tile_d, S), lambda i: (i, 0)),       # incidence mask tile
    ]
    args = [dst_feat, src_feat, wq, bq, wk, bk, wv, bv, mask]

    if with_dropout:
        in_specs.append(pl.BlockSpec((tile_d, dv), lambda i: (i, 0)))
        args.append(drop_mult)
        out_shape = (jax.ShapeDtypeStruct((D, dv), jnp.float32),
                     jax.ShapeDtypeStruct((D, dv), jnp.float32))
        out_specs = (pl.BlockSpec((tile_d, dv), lambda i: (i, 0)),
                     pl.BlockSpec((tile_d, dv), lambda i: (i, 0)))
    else:
        out_shape = jax.ShapeDtypeStruct((D, dv), jnp.float32)
        out_specs = pl.BlockSpec((tile_d, dv), lambda i: (i, 0))

    return pl.pallas_call(
        functools.partial(_fused_hyattn_kernel,
                          scale=1.0 / math.sqrt(q_d),
                          with_dropout=with_dropout),
        grid=(D // tile_d,),
        out_shape=out_shape,
        in_specs=in_specs,
        out_specs=out_specs,
        compiler_params=pltpu.CompilerParams(dimension_semantics=("parallel",)),
    )(*args)


def _head_kernel(x_ref, wf_ref, bf_ref, wc_ref, bc_ref, o_ref):
    h = jnp.dot(x_ref[...], wf_ref[...], preferred_element_type=jnp.float32) + bf_ref[...]
    h = jnp.maximum(h, 0.0)                             # ReLU(Flatten(output0))
    y = jnp.dot(h, wc_ref[...], preferred_element_type=jnp.float32) + bc_ref[...]
    o_ref[...] = y.astype(o_ref.dtype)


def classifier_head(x, w_flat_t, b_flat, w_cls_t, b_cls):
    M, d_in = x.shape
    d_h = w_flat_t.shape[1]
    d_out = w_cls_t.shape[1]
    tile_m = _row_tile(M)
    return pl.pallas_call(
        _head_kernel,
        grid=(M // tile_m,),
        out_shape=jax.ShapeDtypeStruct((M, d_out), jnp.float32),
        in_specs=[
            pl.BlockSpec((tile_m, d_in), lambda i: (i, 0)),
            pl.BlockSpec((d_in, d_h), lambda i: (0, 0)),
            pl.BlockSpec((1, d_h), lambda i: (0, 0)),
            pl.BlockSpec((d_h, d_out), lambda i: (0, 0)),
            pl.BlockSpec((1, d_out), lambda i: (0, 0)),
        ],
        out_specs=pl.BlockSpec((tile_m, d_out), lambda i: (i, 0)),
        compiler_params=pltpu.CompilerParams(dimension_semantics=("parallel",)),
    )(x, w_flat_t, b_flat, w_cls_t, b_cls)


# ----------------------------------------------------------------------------
# Parameter init (PyTorch nn.Linear default: U(-1/sqrt(fan_in), +1/sqrt(fan_in))),
# stored pre-transposed as (in, out) with (1, out) biases.
# ----------------------------------------------------------------------------
def init_params(key, i_d, q_d, v_d, e_d, num_class):
    shapes = {                       # (out, in) as in nn.Linear
        "first_layer_in": (v_d, i_d),
        "not_first_layer_in": (v_d, v_d),
        "w1": (q_d, e_d),
        "w2": (q_d, v_d),
        "w3": (e_d, v_d),
        "w4": (q_d, v_d),
        "w5": (q_d, e_d),
        "w6": (v_d, e_d),
        "full3": (500, 149),         # kept for parameter parity; forward compute is dead
        "full4": (250, 500),
        "full5": (128, 250),
        "Flatten": (64, 149),
        "cls": (num_class, 64),
    }
    params = {}
    keys = jax.random.split(key, len(shapes))
    for kk, (name, (o, i)) in zip(keys, shapes.items()):
        kw, kb = jax.random.split(kk)
        bound = 1.0 / math.sqrt(i)
        w = jax.random.uniform(kw, (o, i), jnp.float32, -bound, bound)
        b = jax.random.uniform(kb, (o,), jnp.float32, -bound, bound)
        params[name] = (w.T, b.reshape(1, o))     # pre-transposed once at init
    return params


# ----------------------------------------------------------------------------
# Forward pass (glue calling the fused Pallas kernels)
# ----------------------------------------------------------------------------
def seq_hygan_forward(params, H, vfeat, efeat, bert_fea, drop_mult, *,
                      first_layer, last_layer, q_d):
    """H: (N_vertices, N_hyperedges) 0/1 incidence mask.

    drop_mult: pre-scaled dropout keep-mask (N, v_d) or None (F.dropout equivalent; the
    on-chip pltpu PRNG has no interpret-mode lowering, so the mask is generated host-side
    and applied in the fused attention epilogue).
    """
    if first_layer:
        feat_e0 = linear(efeat, *params["first_layer_in"])
    else:
        feat_e0 = linear(efeat, *params["not_first_layer_in"])
    feat_v0 = vfeat

    # etype 'con': hyperedge (src) -> vertex (dst); q=w4(feat_v), k=w5(feat_e), v=w6(feat_e)
    if drop_mult is not None and not last_layer:
        feat_v, feat_v_dropped = fused_hyper_attention(
            feat_v0, feat_e0,
            params["w4"][0], params["w4"][1],
            params["w5"][0], params["w5"][1],
            params["w6"][0], params["w6"][1],
            H, q_d, drop_mult=drop_mult)
    else:
        feat_v = fused_hyper_attention(
            feat_v0, feat_e0,
            params["w4"][0], params["w4"][1],
            params["w5"][0], params["w5"][1],
            params["w6"][0], params["w6"][1],
            H, q_d)
        feat_v_dropped = feat_v

    # etype 'in': vertex (src) -> hyperedge (dst); q=w1(pre-attention feat_e),
    # k=w2(feat_v), v=w3(feat_v).  Note: uses the PRE-dropout feat_v, as in the reference.
    feat_e = fused_hyper_attention(
        feat_e0, feat_v,
        params["w1"][0], params["w1"][1],
        params["w2"][0], params["w2"][1],
        params["w3"][0], params["w3"][1],
        H.T, q_d)

    if not last_layer:
        # (the DGL graph handle itself is not returned; only the updated features)
        return feat_v_dropped, feat_e

    # last-layer classifier head.
    # TODO(synk): original code loads 'bert_fea.txt' from disk; deterministic synthetic
    #             features of matching width are used instead.
    # NOTE: full3/full4/full5 results are dead in the reference forward (label is
    #       overwritten by relu(Flatten(output0)) before cls) -> not computed here.
    output0 = jnp.concatenate([feat_e, bert_fea], axis=-1)          # (E, 149)
    pred = classifier_head(output0,
                           params["Flatten"][0], params["Flatten"][1],
                           params["cls"][0], params["cls"][1])
    return pred


# ----------------------------------------------------------------------------
if __name__ == "__main__":
    key = jax.random.PRNGKey(0)
    N, E = 16, 8                                   # vertices, hyperedges
    i_d, q_d, v_d, e_d, num_class = 16, 32, 32, 32, 4
    bert_dim = 149 - e_d                           # Flatten expects concat width 149
    dropout_rate = 0.5

    kp, kv, ke, kh, kb, kd = jax.random.split(key, 6)
    params = init_params(kp, i_d, q_d, v_d, e_d, num_class)
    vfeat = jax.random.normal(kv, (N, v_d), jnp.float32)
    efeat = jax.random.normal(ke, (E, i_d), jnp.float32)

    # deterministic incidence; guarantee every vertex and hyperedge is incident to something
    H = (jax.random.uniform(kh, (N, E)) < 0.4).astype(jnp.float32)
    H = H.at[jnp.arange(N), jnp.arange(N) % E].set(1.0)

    bert_fea = jax.random.normal(kb, (E, bert_dim), jnp.float32)

    # F.dropout equivalent: keep-mask scaled by 1/(1-p), fused into the attention epilogue
    keep = jax.random.bernoulli(kd, 1.0 - dropout_rate, (N, v_d))
    drop_mult = keep.astype(jnp.float32) / (1.0 - dropout_rate)

    fwd = jax.jit(seq_hygan_forward,
                  static_argnames=("first_layer", "last_layer", "q_d"))

    # layer 1: first_layer=True, last_layer=False -> updated (feat_v, feat_e)
    feat_v, feat_e = fwd(params, H, vfeat, efeat, bert_fea, drop_mult,
                         first_layer=True, last_layer=False, q_d=q_d)

    # layer 2: first_layer=False, last_layer=True -> class logits
    pred = fwd(params, H, feat_v, feat_e, bert_fea, None,
               first_layer=False, last_layer=True, q_d=q_d)

    jax.block_until_ready((feat_v, feat_e, pred))
    assert feat_v.shape == (N, v_d)
    assert feat_e.shape == (E, e_d)
    assert pred.shape == (E, num_class)
    print("KERNEL_OK")
</pallas_src>

<mosaic_0001>
module attributes {stable_mosaic.version = 11 : i64} {
  func.func @_linear_kernel(%arg0: i32, %arg1: memref<8x16xf32, #tpu.memory_space<vmem>>, %arg2: memref<16x32xf32, #tpu.memory_space<vmem>>, %arg3: memref<1x32xf32, #tpu.memory_space<vmem>>, %arg4: memref<8x32xf32, #tpu.memory_space<vmem>>) attributes {dimension_semantics = [#tpu.dimension_semantics<parallel>], iteration_bounds = array<i64: 1>, scalar_prefetch = 0 : i64, scratch_operands = 0 : i64, tpu.core_type = #tpu.core_type<tc>, window_params = [{transform_indices = @transform_0, window_bounds = array<i64: 8, 16>}, {pipeline_mode = #tpu.pipeline_mode<synchronous>, transform_indices = @transform_1, window_bounds = array<i64: 16, 32>}, {pipeline_mode = #tpu.pipeline_mode<synchronous>, transform_indices = @transform_2, window_bounds = array<i64: 1, 32>}, {transform_indices = @transform_3, window_bounds = array<i64: 8, 32>}]} {
    %c0 = arith.constant 0 : index
    %c0_0 = arith.constant 0 : index
    %0 = vector.load %arg1[%c0, %c0_0] : memref<8x16xf32, #tpu.memory_space<vmem>>, vector<8x16xf32>
    %c0_1 = arith.constant 0 : index
    %c0_2 = arith.constant 0 : index
    %1 = vector.load %arg2[%c0_1, %c0_2] : memref<16x32xf32, #tpu.memory_space<vmem>>, vector<16x32xf32>
    %cst = arith.constant dense<0.000000e+00> : vector<8x32xf32>
    %2 = tpu.matmul %0, %1, %cst {dimension_numbers = #tpu.dot_dimension_numbers<[1], [0], [0], [1], [0, 0, 1, 1], [], []>} : vector<8x16xf32>, vector<16x32xf32>, vector<8x32xf32> -> vector<8x32xf32>
    %c0_3 = arith.constant 0 : index
    %c0_4 = arith.constant 0 : index
    %3 = vector.load %arg3[%c0_3, %c0_4] : memref<1x32xf32, #tpu.memory_space<vmem>>, vector<1x32xf32>
    %4 = vector.broadcast %3 : vector<1x32xf32> to vector<8x32xf32>
    %5 = arith.addf %2, %4 : vector<8x32xf32>
    %c0_5 = arith.constant 0 : index
    %c0_6 = arith.constant 0 : index
    %6 = vector.load %arg4[%c0_5, %c0_6] : memref<8x32xf32, #tpu.memory_space<vmem>>, vector<8x32xf32>
    tpu.vector_store %arg4[%c0_5, %c0_6], %5 {strides = array<i32>} : memref<8x32xf32, #tpu.memory_space<vmem>>, vector<8x32xf32>,
    return
  }
  func.func @transform_0(%arg0: i32) -> (i32, i32) {
    %c0_i32 = arith.constant 0 : i32
    %c0_i32_0 = arith.constant 0 : i32
    return %arg0, %c0_i32 : i32, i32
  }
  func.func @transform_1(%arg0: i32) -> (i32, i32) {
    %c0_i32 = arith.constant 0 : i32
    %c0_i32_0 = arith.constant 0 : i32
    %c0_i32_1 = arith.constant 0 : i32
    return %c0_i32, %c0_i32_0 : i32, i32
  }
  func.func @transform_2(%arg0: i32) -> (i32, i32) {
    %c0_i32 = arith.constant 0 : i32
    %c0_i32_0 = arith.constant 0 : i32
    %c0_i32_1 = arith.constant 0 : i32
    return %c0_i32, %c0_i32_0 : i32, i32
  }
  func.func @transform_3(%arg0: i32) -> (i32, i32) {
    %c0_i32 = arith.constant 0 : i32
    %c0_i32_0 = arith.constant 0 : i32
    return %arg0, %c0_i32 : i32, i32
  }
}

module attributes {stable_mosaic.version = 11 : i64} {
  func.func @_fused_hyattn_kernel(%arg0: i32, %arg1: memref<16x32xf32, #tpu.memory_space<vmem>>, %arg2: memref<8x32xf32, #tpu.memory_space<vmem>>, %arg3: memref<32x32xf32, #tpu.memory_space<vmem>>, %arg4: memref<1x32xf32, #tpu.memory_space<vmem>>, %arg5: memref<32x32xf32, #tpu.memory_space<vmem>>, %arg6: memref<1x32xf32, #tpu.memory_space<vmem>>, %arg7: memref<32x32xf32, #tpu.memory_space<vmem>>, %arg8: memref<1x32xf32, #tpu.memory_space<vmem>>, %arg9: memref<16x8xf32, #tpu.memory_space<vmem>>, %arg10: memref<16x32xf32, #tpu.memory_space<vmem>>, %arg11: memref<16x32xf32, #tpu.memory_space<vmem>>, %arg12: memref<16x32xf32, #tpu.memory_space<vmem>>) attributes {dimension_semantics = [#tpu.dimension_semantics<parallel>], iteration_bounds = array<i64: 1>, scalar_prefetch = 0 : i64, scratch_operands = 0 : i64, tpu.core_type = #tpu.core_type<tc>, window_params = [{transform_indices = @transform_0, window_bounds = array<i64: 16, 32>}, {pipeline_mode = #tpu.pipeline_mode<synchronous>, transform_indices = @transform_1, window_bounds = array<i64: 8, 32>}, {pipeline_mode = #tpu.pipeline_mode<synchronous>, transform_indices = @transform_2, window_bounds = array<i64: 32, 32>}, {pipeline_mode = #tpu.pipeline_mode<synchronous>, transform_indices = @transform_3, window_bounds = array<i64: 1, 32>}, {pipeline_mode = #tpu.pipeline_mode<synchronous>, transform_indices = @transform_4, window_bounds = array<i64: 32, 32>}, {pipeline_mode = #tpu.pipeline_mode<synchronous>, transform_indices = @transform_5, window_bounds = array<i64: 1, 32>}, {pipeline_mode = #tpu.pipeline_mode<synchronous>, transform_indices = @transform_6, window_bounds = array<i64: 32, 32>}, {pipeline_mode = #tpu.pipeline_mode<synchronous>, transform_indices = @transform_7, window_bounds = array<i64: 1, 32>}, {transform_indices = @transform_8, window_bounds = array<i64: 16, 8>}, {transform_indices = @transform_9, window_bounds = array<i64: 16, 32>}, {transform_indices = @transform_10, window_bounds = array<i64: 16, 32>}, {transform_indices = @transform_11, window_bounds = array<i64: 16, 32>}]} {
    %c0 = arith.constant 0 : index
    %c0_0 = arith.constant 0 : index
    %0 = vector.load %arg1[%c0, %c0_0] : memref<16x32xf32, #tpu.memory_space<vmem>>, vector<16x32xf32>
    %c0_1 = arith.constant 0 : index
    %c0_2 = arith.constant 0 : index
    %1 = vector.load %arg3[%c0_1, %c0_2] : memref<32x32xf32, #tpu.memory_space<vmem>>, vector<32x32xf32>
    %cst = arith.constant dense<0.000000e+00> : vector<16x32xf32>
    %2 = tpu.matmul %0, %1, %cst {dimension_numbers = #tpu.dot_dimension_numbers<[1], [0], [0], [1], [0, 0, 1, 1], [], []>} : vector<16x32xf32>, vector<32x32xf32>, vector<16x32xf32> -> vector<16x32xf32>
    %c0_3 = arith.constant 0 : index
    %c0_4 = arith.constant 0 : index
    %3 = vector.load %arg4[%c0_3, %c0_4] : memref<1x32xf32, #tpu.memory_space<vmem>>, vector<1x32xf32>
    %4 = vector.broadcast %3 : vector<1x32xf32> to vector<16x32xf32>
    %5 = arith.addf %2, %4 : vector<16x32xf32>
    %c0_5 = arith.constant 0 : index
    %c0_6 = arith.constant 0 : index
    %6 = vector.load %arg2[%c0_5, %c0_6] : memref<8x32xf32, #tpu.memory_space<vmem>>, vector<8x32xf32>
    %c0_7 = arith.constant 0 : index
    %c0_8 = arith.constant 0 : index
    %7 = vector.load %arg5[%c0_7, %c0_8] : memref<32x32xf32, #tpu.memory_space<vmem>>, vector<32x32xf32>
    %cst_9 = arith.constant dense<0.000000e+00> : vector<8x32xf32>
    %8 = tpu.matmul %6, %7, %cst_9 {dimension_numbers = #tpu.dot_dimension_numbers<[1], [0], [0], [1], [0, 0, 1, 1], [], []>} : vector<8x32xf32>, vector<32x32xf32>, vector<8x32xf32> -> vector<8x32xf32>
    %c0_10 = arith.constant 0 : index
    %c0_11 = arith.constant 0 : index
    %9 = vector.load %arg6[%c0_10, %c0_11] : memref<1x32xf32, #tpu.memory_space<vmem>>, vector<1x32xf32>
    %10 = vector.broadcast %9 : vector<1x32xf32> to vector<8x32xf32>
    %11 = arith.addf %8, %10 : vector<8x32xf32>
    %c0_12 = arith.constant 0 : index
    %c0_13 = arith.constant 0 : index
    %12 = vector.load %arg2[%c0_12, %c0_13] : memref<8x32xf32, #tpu.memory_space<vmem>>, vector<8x32xf32>
    %c0_14 = arith.constant 0 : index
    %c0_15 = arith.constant 0 : index
    %13 = vector.load %arg7[%c0_14, %c0_15] : memref<32x32xf32, #tpu.memory_space<vmem>>, vector<32x32xf32>
    %cst_16 = arith.constant dense<0.000000e+00> : vector<8x32xf32>
    %14 = tpu.matmul %12, %13, %cst_16 {dimension_numbers = #tpu.dot_dimension_numbers<[1], [0], [0], [1], [0, 0, 1, 1], [], []>} : vector<8x32xf32>, vector<32x32xf32>, vector<8x32xf32> -> vector<8x32xf32>
    %c0_17 = arith.constant 0 : index
    %c0_18 = arith.constant 0 : index
    %15 = vector.load %arg8[%c0_17, %c0_18] : memref<1x32xf32, #tpu.memory_space<vmem>>, vector<1x32xf32>
    %16 = vector.broadcast %15 : vector<1x32xf32> to vector<8x32xf32>
    %17 = arith.addf %14, %16 : vector<8x32xf32>
    %cst_19 = arith.constant 0.176776692 : f32
    %18 = vector.broadcast %cst_19 : f32 to vector<16x32xf32>
    %19 = arith.mulf %5, %18 : vector<16x32xf32>
    %cst_20 = arith.constant dense<0.000000e+00> : vector<16x8xf32>
    %20 = tpu.matmul %19, %11, %cst_20 {dimension_numbers = #tpu.dot_dimension_numbers<[1], [1], [0], [0], [0, 0, 1, 0], [], []>} : vector<16x32xf32>, vector<8x32xf32>, vector<16x8xf32> -> vector<16x8xf32>
    %cst_21 = arith.constant 0.000000e+00 : f32
    %21 = vector.broadcast %cst_21 : f32 to vector<16x8xf32>
    %22 = arith.cmpf oge, %20, %21 : vector<16x8xf32>
    %cst_22 = arith.constant 0.00999999977 : f32
    %23 = vector.broadcast %cst_22 : f32 to vector<16x8xf32>
    %24 = arith.mulf %23, %20 : vector<16x8xf32>
    %25 = arith.select %22, %20, %24 : vector<16x8xi1>, vector<16x8xf32>
    %c0_23 = arith.constant 0 : index
    %c0_24 = arith.constant 0 : index
    %26 = vector.load %arg9[%c0_23, %c0_24] : memref<16x8xf32, #tpu.memory_space<vmem>>, vector<16x8xf32>
    %cst_25 = arith.constant 0.000000e+00 : f32
    %27 = vector.broadcast %cst_25 : f32 to vector<16x8xf32>
    %28 = arith.cmpf ogt, %26, %27 : vector<16x8xf32>
    %cst_26 = arith.constant -1.000000e+30 : f32
    %29 = vector.broadcast %cst_26 : f32 to vector<16x8xf32>
    %30 = arith.select %28, %25, %29 : vector<16x8xi1>, vector<16x8xf32>
    %cst_27 = arith.constant dense<0xFF800000> : vector<16xf32>
    %31 = vector.multi_reduction <maximumf>, %30, %cst_27 [1] : vector<16x8xf32> to vector<16xf32>
    %32 = vector.shape_cast %31 : vector<16xf32> to vector<16x1xf32>
    %33 = vector.broadcast %32 : vector<16x1xf32> to vector<16x8xf32>
    %34 = arith.subf %30, %33 : vector<16x8xf32>
    %35 = math.exp %34 : vector<16x8xf32>
    %cst_28 = arith.constant dense<0.000000e+00> : vector<16xf32>
    %36 = vector.multi_reduction <add>, %35, %cst_28 [1] : vector<16x8xf32> to vector<16xf32>
    %37 = vector.shape_cast %36 : vector<16xf32> to vector<16x1xf32>
    %cst_29 = arith.constant 1.000000e+00 : f32
    %38 = vector.broadcast %cst_29 : f32 to vector<16x1xf32>
    %39 = arith.divf %38, %37 : vector<16x1xf32>
    %40 = vector.broadcast %39 : vector<16x1xf32> to vector<16x8xf32>
    %41 = arith.mulf %35, %40 : vector<16x8xf32>
    %cst_30 = arith.constant dense<0.000000e+00> : vector<16x32xf32>
    %42 = tpu.matmul %41, %17, %cst_30 {dimension_numbers = #tpu.dot_dimension_numbers<[1], [0], [0], [1], [0, 0, 1, 1], [], []>} : vector<16x8xf32>, vector<8x32xf32>, vector<16x32xf32> -> vector<16x32xf32>
    %c0_31 = arith.constant 0 : index
    %c0_32 = arith.constant 0 : index
    %43 = vector.load %arg9[%c0_31, %c0_32] : memref<16x8xf32, #tpu.memory_space<vmem>>, vector<16x8xf32>
    %cst_33 = arith.constant dense<0.000000e+00> : vector<16xf32>
    %44 = vector.multi_reduction <add>, %43, %cst_33 [1] : vector<16x8xf32> to vector<16xf32>
    %45 = vector.shape_cast %44 : vector<16xf32> to vector<16x1xf32>
    %cst_34 = arith.constant 0.000000e+00 : f32
    %46 = vector.broadcast %cst_34 : f32 to vector<16x1xf32>
    %47 = arith.cmpf ogt, %45, %46 : vector<16x1xf32>
    %cst_35 = arith.constant 0.000000e+00 : f32
    %48 = vector.shape_cast %47 : vector<16x1xi1> to vector<16x1xi1>
    %49 = vector.broadcast %48 : vector<16x1xi1> to vector<16x32xi1>
    %50 = vector.broadcast %cst_35 : f32 to vector<16x32xf32>
    %51 = arith.select %49, %42, %50 : vector<16x32xi1>, vector<16x32xf32>
    %c0_36 = arith.constant 0 : index
    %c0_37 = arith.constant 0 : index
    %52 = vector.load %arg11[%c0_36, %c0_37] : memref<16x32xf32, #tpu.memory_space<vmem>>, vector<16x32xf32>
    tpu.vector_store %arg11[%c0_36, %c0_37], %51 {strides = array<i32>} : memref<16x32xf32, #tpu.memory_space<vmem>>, vector<16x32xf32>,
    %c0_38 = arith.constant 0 : index
    %c0_39 = arith.constant 0 : index
    %53 = vector.load %arg10[%c0_38, %c0_39] : memref<16x32xf32, #tpu.memory_space<vmem>>, vector<16x32xf32>
    %54 = arith.mulf %51, %53 : vector<16x32xf32>
    %c0_40 = arith.constant 0 : index
    %c0_41 = arith.constant 0 : index
    %55 = vector.load %arg12[%c0_40, %c0_41] : memref<16x32xf32, #tpu.memory_space<vmem>>, vector<16x32xf32>
    tpu.vector_store %arg12[%c0_40, %c0_41], %54 {strides = array<i32>} : memref<16x32xf32, #tpu.memory_space<vmem>>, vector<16x32xf32>,
    return
  }
  func.func @transform_0(%arg0: i32) -> (i32, i32) {
    %c0_i32 = arith.constant 0 : i32
    %c0_i32_0 = arith.constant 0 : i32
    return %arg0, %c0_i32 : i32, i32
  }
  func.func @transform_1(%arg0: i32) -> (i32, i32) {
    %c0_i32 = arith.constant 0 : i32
    %c0_i32_0 = arith.constant 0 : i32
    %c0_i32_1 = arith.constant 0 : i32
    return %c0_i32, %c0_i32_0 : i32, i32
  }
  func.func @transform_2(%arg0: i32) -> (i32, i32) {
    %c0_i32 = arith.constant 0 : i32
    %c0_i32_0 = arith.constant 0 : i32
    %c0_i32_1 = arith.constant 0 : i32
    return %c0_i32, %c0_i32_0 : i32, i32
  }
  func.func @transform_3(%arg0: i32) -> (i32, i32) {
    %c0_i32 = arith.constant 0 : i32
    %c0_i32_0 = arith.constant 0 : i32
    %c0_i32_1 = arith.constant 0 : i32
    return %c0_i32, %c0_i32_0 : i32, i32
  }
  func.func @transform_4(%arg0: i32) -> (i32, i32) {
    %c0_i32 = arith.constant 0 : i32
    %c0_i32_0 = arith.constant 0 : i32
    %c0_i32_1 = arith.constant 0 : i32
    return %c0_i32, %c0_i32_0 : i32, i32
  }
  func.func @transform_5(%arg0: i32) -> (i32, i32) {
    %c0_i32 = arith.constant 0 : i32
    %c0_i32_0 = arith.constant 0 : i32
    %c0_i32_1 = arith.constant 0 : i32
    return %c0_i32, %c0_i32_0 : i32, i32
  }
  func.func @transform_6(%arg0: i32) -> (i32, i32) {
    %c0_i32 = arith.constant 0 : i32
    %c0_i32_0 = arith.constant 0 : i32
    %c0_i32_1 = arith.constant 0 : i32
    return %c0_i32, %c0_i32_0 : i32, i32
  }
  func.func @transform_7(%arg0: i32) -> (i32, i32) {
    %c0_i32 = arith.constant 0 : i32
    %c0_i32_0 = arith.constant 0 : i32
    %c0_i32_1 = arith.constant 0 : i32
    return %c0_i32, %c0_i32_0 : i32, i32
  }
  func.func @transform_8(%arg0: i32) -> (i32, i32) {
    %c0_i32 = arith.constant 0 : i32
    %c0_i32_0 = arith.constant 0 : i32
    return %arg0, %c0_i32 : i32, i32
  }
  func.func @transform_9(%arg0: i32) -> (i32, i32) {
    %c0_i32 = arith.constant 0 : i32
    %c0_i32_0 = arith.constant 0 : i32
    return %arg0, %c0_i32 : i32, i32
  }
  func.func @transform_10(%arg0: i32) -> (i32, i32) {
    %c0_i32 = arith.constant 0 : i32
    %c0_i32_0 = arith.constant 0 : i32
    return %arg0, %c0_i32 : i32, i32
  }
  func.func @transform_11(%arg0: i32) -> (i32, i32) {
    %c0_i32 = arith.constant 0 : i32
    %c0_i32_0 = arith.constant 0 : i32
    return %arg0, %c0_i32 : i32, i32
  }
}

module attributes {stable_mosaic.version = 11 : i64} {
  func.func @_fused_hyattn_kernel(%arg0: i32, %arg1: memref<8x32xf32, #tpu.memory_space<vmem>>, %arg2: memref<16x32xf32, #tpu.memory_space<vmem>>, %arg3: memref<32x32xf32, #tpu.memory_space<vmem>>, %arg4: memref<1x32xf32, #tpu.memory_space<vmem>>, %arg5: memref<32x32xf32, #tpu.memory_space<vmem>>, %arg6: memref<1x32xf32, #tpu.memory_space<vmem>>, %arg7: memref<32x32xf32, #tpu.memory_space<vmem>>, %arg8: memref<1x32xf32, #tpu.memory_space<vmem>>, %arg9: memref<8x16xf32, #tpu.memory_space<vmem>>, %arg10: memref<8x32xf32, #tpu.memory_space<vmem>>) attributes {dimension_semantics = [#tpu.dimension_semantics<parallel>], iteration_bounds = array<i64: 1>, scalar_prefetch = 0 : i64, scratch_operands = 0 : i64, tpu.core_type = #tpu.core_type<tc>, window_params = [{transform_indices = @transform_0, window_bounds = array<i64: 8, 32>}, {pipeline_mode = #tpu.pipeline_mode<synchronous>, transform_indices = @transform_1, window_bounds = array<i64: 16, 32>}, {pipeline_mode = #tpu.pipeline_mode<synchronous>, transform_indices = @transform_2, window_bounds = array<i64: 32, 32>}, {pipeline_mode = #tpu.pipeline_mode<synchronous>, transform_indices = @transform_3, window_bounds = array<i64: 1, 32>}, {pipeline_mode = #tpu.pipeline_mode<synchronous>, transform_indices = @transform_4, window_bounds = array<i64: 32, 32>}, {pipeline_mode = #tpu.pipeline_mode<synchronous>, transform_indices = @transform_5, window_bounds = array<i64: 1, 32>}, {pipeline_mode = #tpu.pipeline_mode<synchronous>, transform_indices = @transform_6, window_bounds = array<i64: 32, 32>}, {pipeline_mode = #tpu.pipeline_mode<synchronous>, transform_indices = @transform_7, window_bounds = array<i64: 1, 32>}, {transform_indices = @transform_8, window_bounds = array<i64: 8, 16>}, {transform_indices = @transform_9, window_bounds = array<i64: 8, 32>}]} {
    %c0 = arith.constant 0 : index
    %c0_0 = arith.constant 0 : index
    %0 = vector.load %arg1[%c0, %c0_0] : memref<8x32xf32, #tpu.memory_space<vmem>>, vector<8x32xf32>
    %c0_1 = arith.constant 0 : index
    %c0_2 = arith.constant 0 : index
    %1 = vector.load %arg3[%c0_1, %c0_2] : memref<32x32xf32, #tpu.memory_space<vmem>>, vector<32x32xf32>
    %cst = arith.constant dense<0.000000e+00> : vector<8x32xf32>
    %2 = tpu.matmul %0, %1, %cst {dimension_numbers = #tpu.dot_dimension_numbers<[1], [0], [0], [1], [0, 0, 1, 1], [], []>} : vector<8x32xf32>, vector<32x32xf32>, vector<8x32xf32> -> vector<8x32xf32>
    %c0_3 = arith.constant 0 : index
    %c0_4 = arith.constant 0 : index
    %3 = vector.load %arg4[%c0_3, %c0_4] : memref<1x32xf32, #tpu.memory_space<vmem>>, vector<1x32xf32>
    %4 = vector.broadcast %3 : vector<1x32xf32> to vector<8x32xf32>
    %5 = arith.addf %2, %4 : vector<8x32xf32>
    %c0_5 = arith.constant 0 : index
    %c0_6 = arith.constant 0 : index
    %6 = vector.load %arg2[%c0_5, %c0_6] : memref<16x32xf32, #tpu.memory_space<vmem>>, vector<16x32xf32>
    %c0_7 = arith.constant 0 : index
    %c0_8 = arith.constant 0 : index
    %7 = vector.load %arg5[%c0_7, %c0_8] : memref<32x32xf32, #tpu.memory_space<vmem>>, vector<32x32xf32>
    %cst_9 = arith.constant dense<0.000000e+00> : vector<16x32xf32>
    %8 = tpu.matmul %6, %7, %cst_9 {dimension_numbers = #tpu.dot_dimension_numbers<[1], [0], [0], [1], [0, 0, 1, 1], [], []>} : vector<16x32xf32>, vector<32x32xf32>, vector<16x32xf32> -> vector<16x32xf32>
    %c0_10 = arith.constant 0 : index
    %c0_11 = arith.constant 0 : index
    %9 = vector.load %arg6[%c0_10, %c0_11] : memref<1x32xf32, #tpu.memory_space<vmem>>, vector<1x32xf32>
    %10 = vector.broadcast %9 : vector<1x32xf32> to vector<16x32xf32>
    %11 = arith.addf %8, %10 : vector<16x32xf32>
    %c0_12 = arith.constant 0 : index
    %c0_13 = arith.constant 0 : index
    %12 = vector.load %arg2[%c0_12, %c0_13] : memref<16x32xf32, #tpu.memory_space<vmem>>, vector<16x32xf32>
    %c0_14 = arith.constant 0 : index
    %c0_15 = arith.constant 0 : index
    %13 = vector.load %arg7[%c0_14, %c0_15] : memref<32x32xf32, #tpu.memory_space<vmem>>, vector<32x32xf32>
    %cst_16 = arith.constant dense<0.000000e+00> : vector<16x32xf32>
    %14 = tpu.matmul %12, %13, %cst_16 {dimension_numbers = #tpu.dot_dimension_numbers<[1], [0], [0], [1], [0, 0, 1, 1], [], []>} : vector<16x32xf32>, vector<32x32xf32>, vector<16x32xf32> -> vector<16x32xf32>
    %c0_17 = arith.constant 0 : index
    %c0_18 = arith.constant 0 : index
    %15 = vector.load %arg8[%c0_17, %c0_18] : memref<1x32xf32, #tpu.memory_space<vmem>>, vector<1x32xf32>
    %16 = vector.broadcast %15 : vector<1x32xf32> to vector<16x32xf32>
    %17 = arith.addf %14, %16 : vector<16x32xf32>
    %cst_19 = arith.constant 0.176776692 : f32
    %18 = vector.broadcast %cst_19 : f32 to vector<8x32xf32>
    %19 = arith.mulf %5, %18 : vector<8x32xf32>
    %cst_20 = arith.constant dense<0.000000e+00> : vector<8x16xf32>
    %20 = tpu.matmul %19, %11, %cst_20 {dimension_numbers = #tpu.dot_dimension_numbers<[1], [1], [0], [0], [0, 0, 1, 0], [], []>} : vector<8x32xf32>, vector<16x32xf32>, vector<8x16xf32> -> vector<8x16xf32>
    %cst_21 = arith.constant 0.000000e+00 : f32
    %21 = vector.broadcast %cst_21 : f32 to vector<8x16xf32>
    %22 = arith.cmpf oge, %20, %21 : vector<8x16xf32>
    %cst_22 = arith.constant 0.00999999977 : f32
    %23 = vector.broadcast %cst_22 : f32 to vector<8x16xf32>
    %24 = arith.mulf %23, %20 : vector<8x16xf32>
    %25 = arith.select %22, %20, %24 : vector<8x16xi1>, vector<8x16xf32>
    %c0_23 = arith.constant 0 : index
    %c0_24 = arith.constant 0 : index
    %26 = vector.load %arg9[%c0_23, %c0_24] : memref<8x16xf32, #tpu.memory_space<vmem>>, vector<8x16xf32>
    %cst_25 = arith.constant 0.000000e+00 : f32
    %27 = vector.broadcast %cst_25 : f32 to vector<8x16xf32>
    %28 = arith.cmpf ogt, %26, %27 : vector<8x16xf32>
    %cst_26 = arith.constant -1.000000e+30 : f32
    %29 = vector.broadcast %cst_26 : f32 to vector<8x16xf32>
    %30 = arith.select %28, %25, %29 : vector<8x16xi1>, vector<8x16xf32>
    %cst_27 = arith.constant dense<0xFF800000> : vector<8xf32>
    %31 = vector.multi_reduction <maximumf>, %30, %cst_27 [1] : vector<8x16xf32> to vector<8xf32>
    %32 = vector.shape_cast %31 : vector<8xf32> to vector<8x1xf32>
    %33 = vector.broadcast %32 : vector<8x1xf32> to vector<8x16xf32>
    %34 = arith.subf %30, %33 : vector<8x16xf32>
    %35 = math.exp %34 : vector<8x16xf32>
    %cst_28 = arith.constant dense<0.000000e+00> : vector<8xf32>
    %36 = vector.multi_reduction <add>, %35, %cst_28 [1] : vector<8x16xf32> to vector<8xf32>
    %37 = vector.shape_cast %36 : vector<8xf32> to vector<8x1xf32>
    %cst_29 = arith.constant 1.000000e+00 : f32
    %38 = vector.broadcast %cst_29 : f32 to vector<8x1xf32>
    %39 = arith.divf %38, %37 : vector<8x1xf32>
    %40 = vector.broadcast %39 : vector<8x1xf32> to vector<8x16xf32>
    %41 = arith.mulf %35, %40 : vector<8x16xf32>
    %cst_30 = arith.constant dense<0.000000e+00> : vector<8x32xf32>
    %42 = tpu.matmul %41, %17, %cst_30 {dimension_numbers = #tpu.dot_dimension_numbers<[1], [0], [0], [1], [0, 0, 1, 1], [], []>} : vector<8x16xf32>, vector<16x32xf32>, vector<8x32xf32> -> vector<8x32xf32>
    %c0_31 = arith.constant 0 : index
    %c0_32 = arith.constant 0 : index
    %43 = vector.load %arg9[%c0_31, %c0_32] : memref<8x16xf32, #tpu.memory_space<vmem>>, vector<8x16xf32>
    %cst_33 = arith.constant dense<0.000000e+00> : vector<8xf32>
    %44 = vector.multi_reduction <add>, %43, %cst_33 [1] : vector<8x16xf32> to vector<8xf32>
    %45 = vector.shape_cast %44 : vector<8xf32> to vector<8x1xf32>
    %cst_34 = arith.constant 0.000000e+00 : f32
    %46 = vector.broadcast %cst_34 : f32 to vector<8x1xf32>
    %47 = arith.cmpf ogt, %45, %46 : vector<8x1xf32>
    %cst_35 = arith.constant 0.000000e+00 : f32
    %48 = vector.shape_cast %47 : vector<8x1xi1> to vector<8x1xi1>
    %49 = vector.broadcast %48 : vector<8x1xi1> to vector<8x32xi1>
    %50 = vector.broadcast %cst_35 : f32 to vector<8x32xf32>
    %51 = arith.select %49, %42, %50 : vector<8x32xi1>, vector<8x32xf32>
    %c0_36 = arith.constant 0 : index
    %c0_37 = arith.constant 0 : index
    %52 = vector.load %arg10[%c0_36, %c0_37] : memref<8x32xf32, #tpu.memory_space<vmem>>, vector<8x32xf32>
    tpu.vector_store %arg10[%c0_36, %c0_37], %51 {strides = array<i32>} : memref<8x32xf32, #tpu.memory_space<vmem>>, vector<8x32xf32>,
    return
  }
  func.func @transform_0(%arg0: i32) -> (i32, i32) {
    %c0_i32 = arith.constant 0 : i32
    %c0_i32_0 = arith.constant 0 : i32
    return %arg0, %c0_i32 : i32, i32
  }
  func.func @transform_1(%arg0: i32) -> (i32, i32) {
    %c0_i32 = arith.constant 0 : i32
    %c0_i32_0 = arith.constant 0 : i32
    %c0_i32_1 = arith.constant 0 : i32
    return %c0_i32, %c0_i32_0 : i32, i32
  }
  func.func @transform_2(%arg0: i32) -> (i32, i32) {
    %c0_i32 = arith.constant 0 : i32
    %c0_i32_0 = arith.constant 0 : i32
    %c0_i32_1 = arith.constant 0 : i32
    return %c0_i32, %c0_i32_0 : i32, i32
  }
  func.func @transform_3(%arg0: i32) -> (i32, i32) {
    %c0_i32 = arith.constant 0 : i32
    %c0_i32_0 = arith.constant 0 : i32
    %c0_i32_1 = arith.constant 0 : i32
    return %c0_i32, %c0_i32_0 : i32, i32
  }
  func.func @transform_4(%arg0: i32) -> (i32, i32) {
    %c0_i32 = arith.constant 0 : i32
    %c0_i32_0 = arith.constant 0 : i32
    %c0_i32_1 = arith.constant 0 : i32
    return %c0_i32, %c0_i32_0 : i32, i32
  }
  func.func @transform_5(%arg0: i32) -> (i32, i32) {
    %c0_i32 = arith.constant 0 : i32
    %c0_i32_0 = arith.constant 0 : i32
    %c0_i32_1 = arith.constant 0 : i32
    return %c0_i32, %c0_i32_0 : i32, i32
  }
  func.func @transform_6(%arg0: i32) -> (i32, i32) {
    %c0_i32 = arith.constant 0 : i32
    %c0_i32_0 = arith.constant 0 : i32
    %c0_i32_1 = arith.constant 0 : i32
    return %c0_i32, %c0_i32_0 : i32, i32
  }
  func.func @transform_7(%arg0: i32) -> (i32, i32) {
    %c0_i32 = arith.constant 0 : i32
    %c0_i32_0 = arith.constant 0 : i32
    %c0_i32_1 = arith.constant 0 : i32
    return %c0_i32, %c0_i32_0 : i32, i32
  }
  func.func @transform_8(%arg0: i32) -> (i32, i32) {
    %c0_i32 = arith.constant 0 : i32
    %c0_i32_0 = arith.constant 0 : i32
    return %arg0, %c0_i32 : i32, i32
  }
  func.func @transform_9(%arg0: i32) -> (i32, i32) {
    %c0_i32 = arith.constant 0 : i32
    %c0_i32_0 = arith.constant 0 : i32
    return %arg0, %c0_i32 : i32, i32
  }
}

</mosaic_0001>

<bundles_post_ra>
// kernel: seq_hygan_forward.3
= control target key start
LH: loop header
LB: loop body
LE: loop exit
PB: predicated region body
PF: predicated region fallthrough
CT: control target
= control target key end

     0   :  { %8 = vsyncpa [#allocation3], 0  ;;  %s265_s0 = inlined_call_operand.hbm [shape: f32[8,16], index: 0, kind: input, shape index: {}]   ;;  %s266_s1 = inlined_call_operand.hbm [shape: f32[16,32], index: 1, kind: input, shape index: {}]   ;;  %s267_s2 = inlined_call_operand.hbm [shape: f32[1,32], index: 2, kind: input, shape index: {}]   ;;  %s268_s3 = inlined_call_operand.vmem [shape: f32[8,32], index: 3, kind: output, shape index: {}]  }
   0x1   :  { %9 = vsyncpa [#allocation5], 0  ;;  %s226_s12 = smov [#allocation4]  }
   0x2   :  { %s25_s13 = sshll.u32 %s226_s12, 4  ;;  %s26_s13 = int_to_ptr.vmem [resolvable:$true] %s25_s13 }
   0x3   :  { %s170_s14 = scalar_lea.vmem %s26_s13, 256  ;;  %p175_p1 = scmp.lt.s32.totalorder %s26_s13, %s26_s13 }
   0x4   :  { %p171_p0 = scmp.ne.s32.totalorder %s26_s13, %s170_s14  ;;  %p176_p2 = scmp.lt.s32.totalorder %s170_s14, %s170_s14 }
   0x6   :  { %p177_p3 = por %p176_p2, %p175_p1 }
   0x8   :  { %p178_p4 = pnand %p177_p3, %p171_p0 }
   0xa   :  { %181 = shalt.err (!%p178_p4)
}
   0xb   :  { %s227_s15 = smov 128   ;;  %s228_s16 = smov 8  }
   0xc   :  { %31 = dma.hbm_to_vmem [thread:$0]  %s266_s1, 256, %s26_s13, [#allocation5], %s227_s15, %s227_s15, %s228_s16  }
   0xd   :  { %s229_s19 = smov [#allocation2]   ;;  %s230_s21 = smov [#allocation6]  }
   0xe   :  { %s16_s20 = sshll.u32 %s229_s19, 4  ;;  %s38_s22 = sshll.u32 %s230_s21, 4  ;;  %s17_s20 = int_to_ptr.vmem [resolvable:$true] %s16_s20  ;;  %s39_s22 = int_to_ptr.vmem [resolvable:$true] %s38_s22 }
   0xf   :  { %s190_s23 = scalar_lea.vmem %s17_s20, 128  ;;  %p195_p6 = scmp.lt.s32.totalorder %s17_s20, %s17_s20 }
  0x10   :  { %p191_p5 = scmp.ne.s32.totalorder %s17_s20, %s190_s23  ;;  %p196_p7 = scmp.lt.s32.totalorder %s190_s23, %s190_s23 }
  0x12   :  { %p197_p8 = por %p196_p7, %p195_p6 }
  0x14   :  { %p198_p9 = pnand %p197_p8, %p191_p5 }
  0x16   :  { %201 = shalt.err (!%p198_p9)
}
  0x17   :  { %19 = dma.hbm_to_vmem [thread:$0]  %s265_s0, 128, %s17_s20, [#allocation3]  }
  0x18   :  { %s210_s26 = scalar_lea.vmem %s39_s22, 16  ;;  %s214_s1 = scalar_lea.vmem %s39_s22, 32 }
  0x19   :  { %p211_p10 = scmp.ne.s32.totalorder %s39_s22, %s210_s26  ;;  %p215_p11 = scmp.lt.s32.totalorder %s39_s22, %s39_s22 }
  0x1a   :  { %p216_p12 = scmp.lt.s32.totalorder %s214_s1, %s210_s26 }
  0x1c   :  { %p217_p13 = por %p216_p12, %p215_p11 }
  0x1e   :  { %p218_p0 = pnand %p217_p13, %p211_p10 }
  0x20   :  { %221 = shalt.err (!%p218_p0)
}
  0x21   :  { %41 = dma.hbm_to_vmem [thread:$0]  %s267_s2, 16, %s39_s22, [#allocation5]  }
  0x22   :  { %222 = dma.done.wait [#allocation3], 128  }
  0x23   :  { %223 = vsyncadd [#allocation3], 4294967168 }
  0x24   :  { %224 = dma.done.wait [#allocation5], 272  }
  0x25   :  { %225 = vsyncadd [#allocation5], 4294967024  ;;  %v231_v0 = vmov 0.0   ;;  %vm232_vm0 = vmmov 0   ;;  %v53_v1 = vld [vmem:[#allocation4 + $0x8] sm:$0xff]  ;;  %v52_v2 = vld [vmem:[#allocation4] sm:$0xff] }
  0x26   :  { %148 = vmatprep.subr.mxu0 %v231_v0  ;;  %152 = vmatprep.mubr.msk.f32.mxu0 %vm232_vm0, %v231_v0  ;;  %v51_v3 = vld [vmem:[#allocation2] sm:$0xff]  ;;  %vm61_vm1 = vcmask 130048   ;;  %v143_v4 = vld [vmem:[#allocation6] ss:$0 sm:$0xff]  ;;  %vm135_vm2 = vcmask 261120  }
  0x27   :  { %149 = vmatpush3.msra.mxu0 %v53_v1 }
  0x28   :  { %150 = vmatprep.subr.mxu0 %v231_v0 }
  0x29   :  { %151 = vmatpush3.msra.mxu0 %v52_v2 }
  0x2a   :  { %153 = vmatmul.mubr.msk.f32.vlgmr.msra.gmra.mxu0 %vm61_vm1, %v51_v3 }
  0xea   :  { %v131_v5 = vpop.f32.mrf.mxu0 }
  0xeb   :  { %v132_v6 = vadd.f32 %v143_v4, %v131_v5 }
  0xec   :  { %v154_v7 = vpop.f32.mrf.mxu0 }
  0xed   :  { %136 = vst.msk [vmem:[%s268_s3] sm:$0xff] %vm135_vm2, %v132_v6 }
  0xee   :  { %141 = vsyncpa [#allocation3], 1 }
  0xef   :  { %142 = vsyncpa [#allocation5], 1 }

// kernel: seq_hygan_forward.5
= control target key start
LH: loop header
LB: loop body
LE: loop exit
PB: predicated region body
PF: predicated region fallthrough
CT: control target
= control target key end

     0   :  { %v604_v3 = vmov 0.0   ;;  %vm45_vm0 = vcmask 261120   ;;  %s744_s0 = inlined_call_operand.vmem [shape: f32[8,32], index: 0, kind: input, shape index: {}]   ;;  %s745_s1 = inlined_call_operand.vmem [shape: f32[16,32], index: 1, kind: input, shape index: {}]   ;;  %s746_s2 = inlined_call_operand.vmem [shape: f32[32,32], index: 2, kind: input, shape index: {}]   ;;  %s747_s3 = inlined_call_operand.vmem [shape: f32[1,32], index: 3, kind: input, shape index: {}]   ;;  %s748_s4 = inlined_call_operand.vmem [shape: f32[32,32], index: 4, kind: input, shape index: {}]   ;;  %s749_s5 = inlined_call_operand.vmem [shape: f32[1,32], index: 5, kind: input, shape index: {}]   ;;  %s750_s6 = inlined_call_operand.vmem [shape: f32[32,32], index: 6, kind: input, shape index: {}]   ;;  %s751_s7 = inlined_call_operand.vmem [shape: f32[1,32], index: 7, kind: input, shape index: {}]   ;;  %s752_s8 = inlined_call_operand.vmem [shape: f32[8,16], index: 8, kind: input, shape index: {}]   ;;  %s753_s9 = inlined_call_operand.hbm [shape: f32[8,32], index: 9, kind: output, shape index: {}]  }
   0x1   :  { %v124_v0 = vld [vmem:[%s748_s4 + $0x18] sm:$0xff]  ;;  %v123_v1 = vld [vmem:[%s748_s4 + $0x10] sm:$0xff]  ;;  %528 = vmatprep.subr.mxu0 %v604_v3  ;;  %v122_v5 = vld [vmem:[%s748_s4 + $0x8] sm:$0xff] }
   0x2   :  { %v37_v2 = vld [vmem:[%s746_s2 + $0x18] sm:$0xff]  ;;  %539 = vmatprep.subr.mxu1 %v124_v0  ;;  %v36_v4 = vld [vmem:[%s746_s2 + $0x10] sm:$0xff]  ;;  %v119_v6 = vld [vmem:[%s745_s1] sm:$0xff] }
   0x3   :  { %540 = vmatpush3.msra.mxu1 %v124_v0  ;;  %529 = vmatpush3.msra.mxu0 %v37_v2 }
   0x4   :  { %541 = vmatprep.subr.mxu1 %v123_v1  ;;  %530 = vmatprep.subr.mxu0 %v604_v3 }
   0x5   :  { %14 = vsyncpa [#allocation3], 0  ;;  %542 = vmatpush3.msra.mxu1 %v123_v1  ;;  %531 = vmatpush3.msra.mxu0 %v36_v4  ;;  %v121_v7 = vld [vmem:[%s748_s4] sm:$0xff]  ;;  %v35_v8 = vld [vmem:[%s746_s2 + $0x8] sm:$0xff]  ;;  %vm605_vm1 = vmmov 0   ;;  %vm385_vm4 = vcmask 130048  }
   0x6   :  { %543 = vmatprep.subr.mxu1 %v122_v5  ;;  %532 = vmatprep.subr.mxu0 %v604_v3  ;;  %v120_v9 = vld [vmem:[%s745_s1 + $0x8] sm:$0xff]  ;;  %v34_v10 = vld [vmem:[%s746_s2] sm:$0xff]  ;;  %v216_v22 = vld [vmem:[%s750_s6 + $0x18] sm:$0xff]  ;;  %s606_s18 = smov [#allocation2]  }
   0x7   :  { %544 = vmatpush3.msra.mxu1 %v122_v5  ;;  %547 = vmatprep.mubr.msk.f32.mxu1 %vm45_vm0, %v119_v6  ;;  %v33_v11 = vld [vmem:[%s744_s0] sm:$0xff]  ;;  %v215_v23 = vld [vmem:[%s750_s6 + $0x10] sm:$0xff]  ;;  %v214_v24 = vld [vmem:[%s750_s6 + $0x8] sm:$0xff]  ;;  %s485_s19 = sshll.u32 %s606_s18, 4  ;;  %s486_s19 = int_to_ptr.vmem [resolvable:$true] %s485_s19 }
   0x8   :  { %545 = vmatprep.subr.mxu1 %v121_v7  ;;  %533 = vmatpush3.msra.mxu0 %v35_v8  ;;  %v495_v12 = vld [vmem:[%s749_s5] ss:$0 sm:$0xff]  ;;  %p587_p1 = scmp.lt.s32.totalorder %s486_s19, %s486_s19 }
   0x9   :  { %546 = vmatpush3.msra.mxu1 %v121_v7  ;;  %534 = vmatprep.subr.mxu0 %v604_v3  ;;  %v493_v14 = vld [vmem:[%s747_s3] ss:$0 sm:$0xff] }
   0xa   :  { %548 = vmatmul.mubr.msk.f32.vlgmr.msra.gmra.mxu1 %vm45_vm0, %v120_v9  ;;  %535 = vmatpush3.msra.mxu0 %v34_v10  ;;  %v213_v25 = vld [vmem:[%s750_s6] sm:$0xff] }
   0xb   :  { %536 = vmatprep.mubr.msk.f32.mxu0 %vm605_vm1, %v604_v3  ;;  %561 = vmatprep.subr.mxu1 %v604_v3  ;;  %v382_v26 = vld [vmem:[%s752_s8] sm:$0xff] }
   0xc   :  { %537 = vmatmul.mubr.msk.f32.vlgmr.msra.gmra.mxu0 %vm45_vm0, %v33_v11  ;;  %565 = vmatprep.mubr.msk.f32.mxu1 %vm605_vm1, %v604_v3  ;;  %vm383_vm3 = vcmp.gt.f32.partialorder %v382_v26, 0.0  ;;  %v498_v39 = vld [vmem:[%s751_s7] ss:$0 sm:$0xff]  ;;  %v471_v43 = vsel %vm385_vm4, %v382_v26, 0.0  ;;  %s582_s7 = scalar_lea.vmem %s486_s19, 128 }
   0xd   :  { %558 = vmatprep.mubr.msk.f32.mxu0 %vm45_vm0, %v119_v6  ;;  %550 = vmatprep.subr.mxu0 %v216_v22  ;;  %p583_p0 = scmp.ne.s32.totalorder %s486_s19, %s582_s7  ;;  %p588_p2 = scmp.lt.s32.totalorder %s582_s7, %s582_s7 }
   0xe   :  { %551 = vmatpush3.msra.mxu0 %v216_v22  ;;  %472 = vadd.xlane.f32.xlu1 %v471_v43 }
   0xf   :  { %552 = vmatprep.subr.mxu0 %v215_v23  ;;  %p589_p3 = por %p588_p2, %p587_p1 }
  0x10   :  { %553 = vmatpush3.msra.mxu0 %v215_v23 }
  0x11   :  { %554 = vmatprep.subr.mxu0 %v214_v24  ;;  %p590_p4 = pnand %p589_p3, %p583_p0 }
  0x12   :  { %555 = vmatpush3.msra.mxu0 %v214_v24 }
  0x13   :  { %556 = vmatprep.subr.mxu0 %v213_v25 }
  0x14   :  { %557 = vmatpush3.msra.mxu0 %v213_v25 }
  0x15   :  { %559 = vmatmul.mubr.msk.f32.vlgmr.msra.gmra.mxu0 %vm45_vm0, %v120_v9  ;;  %568 = vmatprep.subr.mxu0 %v604_v3 }
  0x16   :  { %572 = vmatprep.mubr.msk.f32.mxu0 %vm605_vm1, %v604_v3 }
  0x97   :  { %v473_v47 = vpop.xlane.xlu1 %472 }
  0x98   :  { %vm474_vm5 = vcmp.gt.f32.partialorder %v473_v47, 0.0 }
  0xca   :  { %v549_v13 = vpop.f32.mrf.mxu1 }
  0xcb   :  { %v210_v15 = vadd.f32 %v549_v13, %v495_v12 }
  0xcc   :  { %v204_v16 = vpop.f32.mrf.mxu1  ;;  %v115_v17 = vpop.f32.mrf.mxu0 }
  0xcd   :  { %v116_v18 = vadd.f32 %v493_v14, %v115_v17  ;;  %562 = vmatpush3.xpose.msk.msra.mxu1 %vm45_vm0, %v210_v15  ;;  %v205_v20 = vadd.f32 %v495_v12, %v204_v16 }
  0xce   :  { %v538_v19 = vpop.f32.mrf.mxu0  ;;  %563 = vmatprep.subr.mxu1 %v604_v3 }
  0xcf   :  { %v299_v21 = vmul.f32 0.17677669, %v116_v18 }
  0xd1   :  { %564 = vmatpush3.xpose.msk.msra.mxu1 %vm45_vm0, %v205_v20 }
  0xd4   :  { %566 = vmatmul.mubr.msk.f32.vlgmr.msra.gmra.mxu1 %vm45_vm0, %v299_v21 }
  0xd5   :  { %v560_v38 = vpop.f32.mrf.mxu0 }
  0xd6   :  { %v296_v40 = vadd.f32 %v560_v38, %v498_v39 }
  0xd7   :  { %v290_v41 = vpop.f32.mrf.mxu0 }
  0xd8   :  { %v291_v42 = vadd.f32 %v498_v39, %v290_v41  ;;  %569 = vmatpush3.msra.mxu0 %v296_v40 }
  0xd9   :  { %570 = vmatprep.subr.mxu0 %v604_v3 }
  0xda   :  { %571 = vmatpush3.msra.mxu0 %v291_v42 }
 0x194   :  { %v375_v27 = vpop.f32.mrf.mxu1 }
 0x195   :  { %vm379_vm2 = vcmp.ge.f32.partialorder %v375_v27, 0.0  ;;  %v380_v28 = vmul.f32 0.01, %v375_v27 }
 0x196   :  { %v567_v29 = vpop.f32.mrf.mxu1 }
 0x197   :  { %v381_v30 = vsel %vm379_vm2, %v375_v27, %v380_v28 }
 0x198   :  { %v384_v31 = vsel %vm383_vm3, %v381_v30, -1e+30 }
 0x199   :  { %v386_v32 = vsel %vm385_vm4, %v384_v31, -inf }
 0x19a   :  { %387 = vmax.xlane.f32.xlu0 %v386_v32 }
 0x223   :  { %v388_v33 = vpop.xlane.xlu0 %387 }
 0x224   :  { %v389_v34 = vsub.f32 %v384_v31, %v388_v33 }
 0x226   :  { %v390_v35 = vmul.f32 1.442695, %v389_v34 }
 0x228   :  { %578 = vpow2.f32 %v390_v35 }
 0x235   :  { %v579_v36 = vpop.eup %578 }
 0x236   :  { %v392_v37 = vsel %vm385_vm4, %v579_v36, 0.0 }
 0x237   :  { %393 = vadd.xlane.f32.xlu0 %v392_v37 }
 0x2c0   :  { %v394_v44 = vpop.xlane.xlu0 %393 }
 0x2c1   :  { %580 = vrcp.f32 %v394_v44 }
 0x2ce   :  { %v581_v45 = vpop.eup %580 }
 0x2cf   :  { %v397_v46 = vmul.f32 %v581_v45, %v579_v36 }
 0x2d1   :  { %573 = vmatmul.mubr.msk.f32.vlgmr.msra.gmra.mxu0 %vm385_vm4, %v397_v46 }
 0x391   :  { %v467_v48 = vpop.f32.mrf.mxu0 }
 0x392   :  { %v477_v49 = vsel %vm474_vm5, %v467_v48, 0.0 }
 0x393   :  { %478 = vst.msk [vmem:[#allocation2] sm:$0xff] %vm45_vm0, %v477_v49  ;;  %v574_v50 = vpop.f32.mrf.mxu0 }
 0x394   :  { %593 = shalt.err (!%p590_p4)
}
 0x395   :  { %488 = dma.vmem_to_hbm [thread:$0]  %s486_s19, 128, %s753_s9, [#allocation3]  }
 0x396   :  { %602 = dma.done.wait [#allocation3], 128  }
 0x397   :  { %603 = vsyncadd [#allocation3], 4294967168 }
 0x398   :  { %492 = vsyncpa [#allocation3], 1 }

// kernel: seq_hygan_forward.4
= control target key start
LH: loop header
LB: loop body
LE: loop exit
PB: predicated region body
PF: predicated region fallthrough
CT: control target
= control target key end

     0   :  { %17 = vsyncpa [#allocation3], 0  ;;  %s997_s0 = inlined_call_operand.hbm [shape: f32[16,32], index: 0, kind: input, shape index: {}]   ;;  %s998_s1 = inlined_call_operand.vmem [shape: f32[8,32], index: 1, kind: input, shape index: {}]   ;;  %s999_s2 = inlined_call_operand.vmem [shape: f32[32,32], index: 2, kind: input, shape index: {}]   ;;  %s1000_s3 = inlined_call_operand.hbm [shape: f32[1,32], index: 3, kind: input, shape index: {}]   ;;  %s1001_s4 = inlined_call_operand.vmem [shape: f32[32,32], index: 4, kind: input, shape index: {}]   ;;  %s1002_s5 = inlined_call_operand.hbm [shape: f32[1,32], index: 5, kind: input, shape index: {}]   ;;  %s1003_s6 = inlined_call_operand.hbm [shape: f32[32,32], index: 6, kind: input, shape index: {}]   ;;  %s1004_s7 = inlined_call_operand.hbm [shape: f32[1,32], index: 7, kind: input, shape index: {}]   ;;  %s1005_s8 = inlined_call_operand.vmem [shape: f32[16,8], index: 8, kind: input, shape index: {}]   ;;  %s1006_s9 = inlined_call_operand.vmem [shape: f32[16,32], index: 9, kind: input, shape index: {}]   ;;  %s1007_s10 = inlined_call_operand.vmem [shape: f32[16,32], index: 10, kind: output, shape index: {0}]   ;;  %s1008_s11 = inlined_call_operand.hbm [shape: f32[16,32], index: 11, kind: output, shape index: {1}]  }
   0x1   :  { %18 = vsyncpa [#allocation6], 0 }
   0x2   :  { %19 = vsyncpa [#allocation9], 0 }
   0x3   :  { %20 = vsyncpa [#allocation4], 0  ;;  %s833_s17 = smov [#allocation5]  }
   0x4   :  { %s43_s18 = sshll.u32 %s833_s17, 4  ;;  %s44_s18 = int_to_ptr.vmem [resolvable:$true] %s43_s18 }
   0x5   :  { %s713_s19 = scalar_lea.vmem %s44_s18, 16  ;;  %s717_s20 = scalar_lea.vmem %s44_s18, 32 }
   0x6   :  { %p714_p0 = scmp.ne.s32.totalorder %s44_s18, %s713_s19  ;;  %p718_p1 = scmp.lt.s32.totalorder %s44_s18, %s44_s18 }
   0x7   :  { %p719_p2 = scmp.lt.s32.totalorder %s717_s20, %s713_s19 }
   0x9   :  { %p720_p3 = por %p719_p2, %p718_p1 }
   0xb   :  { %p721_p4 = pnand %p720_p3, %p714_p0 }
   0xd   :  { %724 = shalt.err (!%p721_p4)
}
   0xe   :  { %46 = dma.hbm_to_vmem [thread:$0]  %s1000_s3, 16, %s44_s18, [#allocation6]  }
   0xf   :  { %s834_s23 = smov [#allocation8]   ;;  %s835_s25 = smov [#allocation2]  }
  0x10   :  { %s64_s24 = sshll.u32 %s834_s23, 4  ;;  %s26_s26 = sshll.u32 %s835_s25, 4  ;;  %s65_s24 = int_to_ptr.vmem [resolvable:$true] %s64_s24  ;;  %s27_s26 = int_to_ptr.vmem [resolvable:$true] %s26_s26 }
  0x11   :  { %s733_s27 = scalar_lea.vmem %s65_s24, 512  ;;  %p738_p6 = scmp.lt.s32.totalorder %s65_s24, %s65_s24 }
  0x12   :  { %p734_p5 = scmp.ne.s32.totalorder %s65_s24, %s733_s27  ;;  %p739_p7 = scmp.lt.s32.totalorder %s733_s27, %s733_s27 }
  0x14   :  { %p740_p8 = por %p739_p7, %p738_p6 }
  0x16   :  { %p741_p9 = pnand %p740_p8, %p734_p5 }
  0x18   :  { %744 = shalt.err (!%p741_p9)
}
  0x19   :  { %s836_s28 = smov 128   ;;  %s837_s29 = smov 8  }
  0x1a   :  { %70 = dma.hbm_to_vmem [thread:$0]  %s1003_s6, 512, %s65_s24, [#allocation9], %s836_s28, %s836_s28, %s837_s29  }
  0x1b   :  { %s753_s3 = scalar_lea.vmem %s27_s26, 256  ;;  %p758_p11 = scmp.lt.s32.totalorder %s27_s26, %s27_s26 }
  0x1c   :  { %p754_p10 = scmp.ne.s32.totalorder %s27_s26, %s753_s3  ;;  %p759_p12 = scmp.lt.s32.totalorder %s753_s3, %s753_s3 }
  0x1e   :  { %p760_p13 = por %p759_p12, %p758_p11 }
  0x20   :  { %p761_p0 = pnand %p760_p13, %p754_p10 }
  0x22   :  { %764 = shalt.err (!%p761_p0)
}
  0x23   :  { %32 = dma.hbm_to_vmem [thread:$0]  %s997_s0, 256, %s27_s26, [#allocation3], %s836_s28, %s836_s28, %s837_s29  }
  0x24   :  { %s838_s15 = smov [#allocation7]   ;;  %s839_s17 = smov [#allocation10]  }
  0x25   :  { %s55_s16 = sshll.u32 %s838_s15, 4  ;;  %s77_s6 = sshll.u32 %s839_s17, 4  ;;  %s56_s16 = int_to_ptr.vmem [resolvable:$true] %s55_s16  ;;  %s78_s6 = int_to_ptr.vmem [resolvable:$true] %s77_s6 }
  0x26   :  { %s773_s18 = scalar_lea.vmem %s56_s16, 16  ;;  %s777_s19 = scalar_lea.vmem %s56_s16, 32 }
  0x27   :  { %p774_p1 = scmp.ne.s32.totalorder %s56_s16, %s773_s18  ;;  %p778_p2 = scmp.lt.s32.totalorder %s56_s16, %s56_s16 }
  0x28   :  { %p779_p3 = scmp.lt.s32.totalorder %s777_s19, %s773_s18 }
  0x2a   :  { %p780_p4 = por %p779_p3, %p778_p2 }
  0x2c   :  { %p781_p5 = pnand %p780_p4, %p774_p1 }
  0x2e   :  { %784 = shalt.err (!%p781_p5)
}
  0x2f   :  { %58 = dma.hbm_to_vmem [thread:$0]  %s1002_s5, 16, %s56_s16, [#allocation6]  }
  0x30   :  { %s793_s22 = scalar_lea.vmem %s78_s6, 16  ;;  %s797_s0 = scalar_lea.vmem %s78_s6, 32 }
  0x31   :  { %p794_p6 = scmp.ne.s32.totalorder %s78_s6, %s793_s22  ;;  %p798_p7 = scmp.lt.s32.totalorder %s78_s6, %s78_s6 }
  0x32   :  { %p799_p8 = scmp.lt.s32.totalorder %s797_s0, %s793_s22 }
  0x34   :  { %p800_p9 = por %p799_p8, %p798_p7 }
  0x36   :  { %p801_p10 = pnand %p800_p9, %p794_p6 }
  0x38   :  { %804 = shalt.err (!%p801_p10)
}
  0x39   :  { %80 = dma.hbm_to_vmem [thread:$0]  %s1004_s7, 16, %s78_s6, [#allocation9]  }
  0x3a   :  { %825 = dma.done.wait [#allocation3], 256  }
  0x3b   :  { %826 = vsyncadd [#allocation3], 4294967040 }
  0x3c   :  { %827 = dma.done.wait [#allocation6], 32  }
  0x3d   :  { %828 = vsyncadd [#allocation6], 4294967264 }
  0x3e   :  { %829 = dma.done.wait [#allocation9], 528  }
  0x3f   :  { %830 = vsyncadd [#allocation9], 4294966768  ;;  %v840_v0 = vmov 0.0   ;;  %vm841_vm0 = vmmov 0   ;;  %v105_v1 = vld [vmem:[%s999_s2 + $0x18] sm:$0xff]  ;;  %v104_v3 = vld [vmem:[%s999_s2 + $0x10] sm:$0xff] }
  0x40   :  { %655 = vmatprep.subr.mxu1 %v840_v0  ;;  %663 = vmatprep.mubr.msk.f32.mxu1 %vm841_vm0, %v840_v0  ;;  %v199_v2 = vld [vmem:[%s1001_s4 + $0x18] sm:$0xff]  ;;  %v198_v4 = vld [vmem:[%s1001_s4 + $0x10] sm:$0xff]  ;;  %v103_v5 = vld [vmem:[%s999_s2 + $0x8] sm:$0xff]  ;;  %vm113_vm1 = vcmask 261120   ;;  %vm459_vm6 = vcmask 64512   ;;  %s842_s5 = smov [#allocation11]  }
  0x41   :  { %644 = vmatprep.subr.mxu0 %v105_v1  ;;  %656 = vmatpush3.msra.mxu1 %v199_v2  ;;  %v197_v6 = vld [vmem:[%s1001_s4 + $0x8] sm:$0xff]  ;;  %v102_v7 = vld [vmem:[%s999_s2] sm:$0xff]  ;;  %v613_v12 = vld [vmem:[#allocation7] ss:$0 sm:$0xff]  ;;  %s594_s25 = sshll.u32 %s842_s5, 4  ;;  %s595_s25 = int_to_ptr.vmem [resolvable:$true] %s594_s25 }
  0x42   :  { %645 = vmatpush3.msra.mxu0 %v105_v1  ;;  %657 = vmatprep.subr.mxu1 %v840_v0  ;;  %v196_v8 = vld [vmem:[%s1001_s4] sm:$0xff]  ;;  %v101_v11 = vld [vmem:[#allocation2 + $0x8] sm:$0xff]  ;;  %v610_v13 = vld [vmem:[#allocation5] ss:$0 sm:$0xff]  ;;  %p810_p12 = scmp.lt.s32.totalorder %s595_s25, %s595_s25 }
  0x43   :  { %646 = vmatprep.subr.mxu0 %v104_v3  ;;  %658 = vmatpush3.msra.mxu1 %v198_v4  ;;  %v100_v9 = vld [vmem:[#allocation2] sm:$0xff]  ;;  %v283_v23 = vld [vmem:[#allocation8 + $0x18] sm:$0xff]  ;;  %v280_v26 = vld [vmem:[#allocation8] sm:$0xff] }
  0x44   :  { %647 = vmatpush3.msra.mxu0 %v104_v3  ;;  %659 = vmatprep.subr.mxu1 %v840_v0  ;;  %v195_v10 = vld [vmem:[%s998_s1] sm:$0xff]  ;;  %v454_v31 = vld [vmem:[%s1005_s8 + $0x8] sm:$0xff]  ;;  %v615_v49 = vld [vmem:[#allocation10] ss:$0 sm:$0xff] }
  0x45   :  { %648 = vmatprep.subr.mxu0 %v103_v5  ;;  %660 = vmatpush3.msra.mxu1 %v197_v6  ;;  %v282_v24 = vld [vmem:[#allocation8 + $0x10] sm:$0xff]  ;;  %v281_v25 = vld [vmem:[#allocation8 + $0x8] sm:$0xff]  ;;  %vm456_vm5 = vcmp.gt.f32.partialorder %v454_v31, 0.0  ;;  %v568_v53 = vsel %vm459_vm6, %v454_v31, 0.0 }
  0x46   :  { %649 = vmatpush3.msra.mxu0 %v103_v5  ;;  %661 = vmatprep.subr.mxu1 %v840_v0  ;;  %v453_v28 = vld [vmem:[%s1005_s8] sm:$0xff]  ;;  %v582_v63 = vld [vmem:[%s1006_s9 + $0x8] sm:$0xff] }
  0x47   :  { %650 = vmatprep.subr.mxu0 %v102_v7  ;;  %662 = vmatpush3.msra.mxu1 %v196_v8  ;;  %vm455_vm4 = vcmp.gt.f32.partialorder %v453_v28, 0.0  ;;  %v565_v54 = vsel %vm459_vm6, %v453_v28, 0.0  ;;  %v581_v2 = vld [vmem:[%s1006_s9] sm:$0xff]  ;;  %s805_s9 = scalar_lea.vmem %s595_s25, 256 }
  0x48   :  { %651 = vmatpush3.msra.mxu0 %v102_v7  ;;  %652 = vmatprep.mubr.msk.f32.mxu0 %vm113_vm1, %v100_v9  ;;  %p806_p11 = scmp.ne.s32.totalorder %s595_s25, %s805_s9  ;;  %p811_p13 = scmp.lt.s32.totalorder %s805_s9, %s805_s9 }
  0x49   :  { %664 = vmatmul.mubr.msk.f32.vlgmr.msra.gmra.mxu1 %vm113_vm1, %v195_v10  ;;  %653 = vmatmul.mubr.msk.f32.vlgmr.msra.gmra.mxu0 %vm113_vm1, %v101_v11 }
  0x4a   :  { %666 = vmatprep.subr.mxu0 %v840_v0  ;;  %674 = vmatprep.mubr.msk.f32.mxu0 %vm841_vm0, %v840_v0  ;;  %p812_p0 = por %p811_p13, %p810_p12 }
  0x4b   :  { %667 = vmatpush3.msra.mxu0 %v283_v23 }
  0x4c   :  { %668 = vmatprep.subr.mxu0 %v840_v0  ;;  %p813_p1 = pnand %p812_p0, %p806_p11 }
  0x4d   :  { %669 = vmatpush3.msra.mxu0 %v282_v24 }
  0x4e   :  { %670 = vmatprep.subr.mxu0 %v840_v0 }
  0x4f   :  { %671 = vmatpush3.msra.mxu0 %v281_v25 }
  0x50   :  { %672 = vmatprep.subr.mxu0 %v840_v0 }
  0x51   :  { %673 = vmatpush3.msra.mxu0 %v280_v26 }
  0x52   :  { %675 = vmatmul.mubr.msk.f32.vlgmr.msra.gmra.mxu0 %vm113_vm1, %v195_v10 }
 0x109   :  { %v276_v14 = vpop.f32.mrf.mxu1  ;;  %v654_v15 = vpop.f32.mrf.mxu0 }
 0x10a   :  { %v277_v16 = vadd.f32 %v613_v12, %v276_v14  ;;  %v192_v17 = vadd.f32 %v654_v15, %v610_v13 }
 0x10b   :  { %v665_v18 = vpop.f32.mrf.mxu1  ;;  %v186_v19 = vpop.f32.mrf.mxu0 }
 0x10c   :  { %v187_v20 = vadd.f32 %v610_v13, %v186_v19  ;;  %677 = vmatprep.subr.msk.mxu1 %vm113_vm1, %v277_v16  ;;  %v362_v22 = vmul.f32 0.17677669, %v192_v17 }
 0x10d   :  { %678 = vmatpush3.xpose.msk.msra.mxu1 %vm113_vm1, %v277_v16 }
 0x10e   :  { %v361_v21 = vmul.f32 0.17677669, %v187_v20 }
 0x110   :  { %679 = vmatprep.mubr.msk.f32.mxu1 %vm113_vm1, %v361_v21 }
 0x111   :  { %680 = vmatmul.mubr.msk.f32.vlgmr.msra.gmra.mxu1 %vm113_vm1, %v362_v22 }
 0x112   :  { %v357_v50 = vpop.f32.mrf.mxu0 }
 0x113   :  { %v358_v51 = vadd.f32 %v615_v49, %v357_v50 }
 0x114   :  { %v676_v52 = vpop.f32.mrf.mxu0 }
 0x115   :  { %682 = vmatprep.subr.mxu1 %v358_v51 }
 0x116   :  { %683 = vmatpush3.msra.mxu1 %v358_v51 }
 0x1d1   :  { %v681_v27 = vpop.f32.mrf.mxu1 }
 0x1d2   :  { %v450_v29 = vmul.f32 0.01, %v681_v27  ;;  %vm448_vm2 = vcmp.ge.f32.partialorder %v681_v27, 0.0 }
 0x1d3   :  { %v438_v30 = vpop.f32.mrf.mxu1 }
 0x1d4   :  { %vm447_vm3 = vcmp.ge.f32.partialorder %v438_v30, 0.0  ;;  %v449_v32 = vmul.f32 0.01, %v438_v30  ;;  %v452_v34 = vsel %vm448_vm2, %v681_v27, %v450_v29 }
 0x1d5   :  { %v458_v37 = vsel %vm456_vm5, %v452_v34, -1e+30 }
 0x1d6   :  { %v451_v33 = vsel %vm447_vm3, %v438_v30, %v449_v32  ;;  %v463_v38 = vsel %vm459_vm6, %v458_v37, -inf }
 0x1d7   :  { %v457_v35 = vsel %vm455_vm4, %v451_v33, -1e+30 }
 0x1d8   :  { %v460_v36 = vsel %vm459_vm6, %v457_v35, -inf }
 0x1d9   :  { %461 = vmax.xlane.f32.xlu0 %v460_v36 }
 0x1dd   :  { %464 = vmax.xlane.f32.xlu0 %v463_v38 }
 0x1e1   :  { %566 = vadd.xlane.f32.xlu0 %v565_v54 }
 0x262   :  { %v462_v39 = vpop.xlane.xlu0 %461 }
 0x263   :  { %v466_v40 = vsub.f32 %v457_v35, %v462_v39 }
 0x265   :  { %v468_v41 = vmul.f32 1.442695, %v466_v40 }
 0x266   :  { %v465_v42 = vpop.xlane.xlu0 %464 }
 0x267   :  { %697 = vpow2.f32 %v468_v41  ;;  %v467_v43 = vsub.f32 %v458_v37, %v465_v42 }
 0x269   :  { %v470_v44 = vmul.f32 1.442695, %v467_v43 }
 0x26a   :  { %v567_v62 = vpop.xlane.xlu0 %566 }
 0x26b   :  { %699 = vpow2.f32 %v470_v44  ;;  %vm571_vm8 = vcmp.gt.f32.partialorder %v567_v62, 0.0 }
 0x274   :  { %v698_v45 = vpop.eup %697 }
 0x275   :  { %v472_v46 = vsel %vm459_vm6, %v698_v45, 0.0 }
 0x276   :  { %473 = vadd.xlane.f32.xlu1 %v472_v46 }
 0x278   :  { %v700_v47 = vpop.eup %699 }
 0x279   :  { %v475_v48 = vsel %vm459_vm6, %v700_v47, 0.0 }
 0x27a   :  { %476 = vadd.xlane.f32.xlu1 %v475_v48 }
 0x27e   :  { %569 = vadd.xlane.f32.xlu1 %v568_v53 }
 0x2ff   :  { %v474_v55 = vpop.xlane.xlu1 %473 }
 0x300   :  { %701 = vrcp.f32 %v474_v55 }
 0x303   :  { %v477_v56 = vpop.xlane.xlu1 %476 }
 0x304   :  { %703 = vrcp.f32 %v477_v56 }
 0x307   :  { %v570_v61 = vpop.xlane.xlu1 %569 }
 0x308   :  { %vm572_vm7 = vcmp.gt.f32.partialorder %v570_v61, 0.0 }
 0x30d   :  { %v702_v57 = vpop.eup %701 }
 0x30e   :  { %v482_v58 = vmul.f32 %v702_v57, %v698_v45 }
 0x310   :  { %684 = vmatprep.mubr.msk.f32.mxu1 %vm459_vm6, %v482_v58 }
 0x311   :  { %v704_v59 = vpop.eup %703 }
 0x312   :  { %v483_v60 = vmul.f32 %v704_v59, %v700_v47 }
 0x314   :  { %685 = vmatmul.mubr.msk.f32.vlgmr.msra.gmra.mxu1 %vm459_vm6, %v483_v60 }
 0x3d4   :  { %v686_v0 = vpop.f32.mrf.mxu1 }
 0x3d5   :  { %v578_v1 = vsel %vm572_vm7, %v686_v0, 0.0 }
 0x3d6   :  { %580 = vst.msk [vmem:[%s1007_s10 + $0x8] sm:$0xff] %vm113_vm1, %v578_v1  ;;  %v584_v3 = vmul.f32 %v582_v63, %v578_v1  ;;  %v556_v4 = vpop.f32.mrf.mxu1 }
 0x3d7   :  { %v577_v5 = vsel %vm571_vm8, %v556_v4, 0.0 }
 0x3d8   :  { %586 = vst.msk [vmem:[#allocation11 + $0x8] sm:$0xff] %vm113_vm1, %v584_v3  ;;  %579 = vst.msk [vmem:[%s1007_s10] sm:$0xff] %vm113_vm1, %v577_v5  ;;  %v583_v6 = vmul.f32 %v581_v2, %v577_v5 }
 0x3da   :  { %585 = vst.msk [vmem:[#allocation11] sm:$0xff] %vm113_vm1, %v583_v6 }
 0x3db   :  { %816 = shalt.err (!%p813_p1)
}
 0x3dc   :  { %600 = dma.vmem_to_hbm [thread:$0]  %s595_s25, 256, %s1008_s11, [#allocation4], %s836_s28, %s836_s28, %s837_s29  }
 0x3dd   :  { %831 = dma.done.wait [#allocation4], 256  }
 0x3de   :  { %832 = vsyncadd [#allocation4], 4294967040 }
 0x3df   :  { %606 = vsyncpa [#allocation3], 1 }
 0x3e0   :  { %607 = vsyncpa [#allocation6], 1 }
 0x3e1   :  { %608 = vsyncpa [#allocation9], 1 }
 0x3e2   :  { %609 = vsyncpa [#allocation4], 1 }

</bundles_post_ra>
